<compile_context>
chip_gen: v7x
topology: tpu7x:2x2x1
jax: 0.10.0
libtpu: 0.0.40
codegen_flags: <defaults>
</compile_context>

<pallas_src>
import functools

import jax
import jax.numpy as jnp
from jax.experimental import pallas as pl
from jax.experimental.pallas import tpu as pltpu


HIDDEN = 64


def _round_up(x, m):
    return ((x + m - 1) // m) * m


def mlp_q_kernel(obs_ref,
                 w1_ref, b1_ref,
                 w2_ref, b2_ref,
                 w3_ref, b3_ref,
                 w4_ref, b4_ref,
                 q_ref):
    """Fused 4-layer MLP Q-function for one batch tile of TB rows."""
    cdt = w1_ref.dtype          # matmul operand dtype (f32 or bf16)

    x = obs_ref[...].astype(cdt)

    h = jnp.dot(x, w1_ref[...], preferred_element_type=jnp.float32) + b1_ref[...]
    h = jnp.tanh(h).astype(cdt)

    h = jnp.dot(h, w2_ref[...], preferred_element_type=jnp.float32) + b2_ref[...]
    h = jnp.tanh(h).astype(cdt)

    h = jnp.dot(h, w3_ref[...], preferred_element_type=jnp.float32) + b3_ref[...]
    h = jnp.tanh(h)             # (TB, 64) f32

    # fc4: (TB, 64) @ (64, 1) rewritten as multiply by the (1, 64) weight row
    # plus a lane reduction -- lands on the idle VPU/XLU slots and avoids an
    # N=1 MXU pass with an awkward result layout.
    q = jnp.sum(h * w4_ref[...].astype(jnp.float32), axis=-1, keepdims=True)
    q = q + b4_ref[...]
    q_ref[...] = q.astype(q_ref.dtype)


def mlp_q_forward(obs, params, *, block_b=1024, matmul_dtype=jnp.float32):
    """q = MLPQFunction(obs).  obs: (B, obs_dim) f32 -> q: (B, 1) f32."""
    B, obs_dim = obs.shape
    w1, b1, w2, b2, w3, b3, w4, b4 = params

    # fc4 weight as a lane-dense (1, 64) row for the VPU/XLU epilogue.
    w4_row = w4.reshape(1, HIDDEN)

    # Matmul operands (obs stream + weights) in the requested dtype; biases
    # stay f32, accumulation stays f32 inside the kernel.
    obs_c = obs.astype(matmul_dtype)
    w1_c, w2_c, w3_c, w4_c = (w.astype(matmul_dtype)
                              for w in (w1, w2, w3, w4_row))

    # Batch tiling: TB rows per grid step (multiple of 8), pad B to a multiple
    # of TB so every tile is full (no tail masking needed).
    TB = min(_round_up(max(B, 1), 8), _round_up(block_b, 8))
    B_pad = _round_up(B, TB)
    if B_pad != B:
        obs_c = jnp.pad(obs_c, ((0, B_pad - B), (0, 0)))
    num_tiles = B_pad // TB

    tile_spec = pl.BlockSpec((TB, obs_dim), lambda i: (i, 0))
    out_spec = pl.BlockSpec((TB, 1), lambda i: (i, 0))
    # Weights / biases: full blocks with a constant index_map -> DMA'd once,
    # resident in VMEM across all batch tiles.
    const = lambda shape: pl.BlockSpec(shape, lambda i: tuple(0 for _ in shape))

    q_pad = pl.pallas_call(
        mlp_q_kernel,
        grid=(num_tiles,),
        out_shape=jax.ShapeDtypeStruct((B_pad, 1), jnp.float32),
        in_specs=[
            tile_spec,
            const(w1_c.shape), const(b1.shape),
            const(w2_c.shape), const(b2.shape),
            const(w3_c.shape), const(b3.shape),
            const(w4_c.shape), const(b4.shape),
        ],
        out_specs=out_spec,
        compiler_params=pltpu.CompilerParams(
            dimension_semantics=("parallel",)),
    )(obs_c, w1_c, b1, w2_c, b2, w3_c, b3, w4_c, b4)

    return q_pad[:B]


def init_params(key, obs_dim, hidden=HIDDEN):
    """Deterministic init mimicking nn.Linear (U[-1/sqrt(fan_in), 1/sqrt(fan_in)]).
    Weights stored as (in_features, out_features); biases as (1, out_features)."""
    dims = [(obs_dim, hidden), (hidden, hidden), (hidden, hidden), (hidden, 1)]
    params = []
    for (fan_in, fan_out) in dims:
        key, kw, kb = jax.random.split(key, 3)
        bound = 1.0 / jnp.sqrt(fan_in)
        w = jax.random.uniform(kw, (fan_in, fan_out), jnp.float32, -bound, bound)
        b = jax.random.uniform(kb, (1, fan_out), jnp.float32, -bound, bound)
        params.extend([w, b])
    return tuple(params)


def reference_forward(obs, params):
    """Plain-JAX reference for correctness checking."""
    w1, b1, w2, b2, w3, b3, w4, b4 = params
    x = jnp.tanh(obs @ w1 + b1)
    x = jnp.tanh(x @ w2 + b2)
    x = jnp.tanh(x @ w3 + b3)
    return x @ w4 + b4


if __name__ == "__main__":
    key = jax.random.PRNGKey(0)
    obs_dim = 16

    k_obs, k_params = jax.random.split(key)
    params = init_params(k_params, obs_dim)

    # Small batch (single grid step), f32 operands: tight check vs reference.
    obs_small = jax.random.normal(k_obs, (8, obs_dim), dtype=jnp.float32)
    q = jax.block_until_ready(jax.jit(mlp_q_forward)(obs_small, params))
    q_ref = reference_forward(obs_small, params)
    assert q.shape == (8, 1), q.shape
    assert jnp.allclose(q, q_ref, atol=1e-5, rtol=1e-5), (q, q_ref)

    # Batch not divisible by the tile: exercises the grid + padding path.
    obs_big = jax.random.normal(k_obs, (300, obs_dim), dtype=jnp.float32)
    fwd = jax.jit(functools.partial(mlp_q_forward, block_b=128))
    q_big = jax.block_until_ready(fwd(obs_big, params))
    q_big_ref = reference_forward(obs_big, params)
    assert q_big.shape == (300, 1), q_big.shape
    assert jnp.allclose(q_big, q_big_ref, atol=1e-5, rtol=1e-5)

    # bf16 matmul operands (v5e/v6e HBM-bound path); f32 accumulation keeps
    # the error at the bf16-rounding level, so use a wider tolerance.
    fwd_bf16 = jax.jit(functools.partial(mlp_q_forward, block_b=128,
                                         matmul_dtype=jnp.bfloat16))
    q_bf16 = jax.block_until_ready(fwd_bf16(obs_big, params))
    assert q_bf16.shape == (300, 1), q_bf16.shape
    assert jnp.allclose(q_bf16, q_big_ref, atol=5e-2, rtol=5e-2)

    print("KERNEL_OK")
</pallas_src>

<mosaic_0001>
module attributes {stable_mosaic.version = 11 : i64} {
  func.func @mlp_q_kernel(%arg0: i32, %arg1: memref<8x16xf32, #tpu.memory_space<vmem>>, %arg2: memref<16x64xf32, #tpu.memory_space<vmem>>, %arg3: memref<1x64xf32, #tpu.memory_space<vmem>>, %arg4: memref<64x64xf32, #tpu.memory_space<vmem>>, %arg5: memref<1x64xf32, #tpu.memory_space<vmem>>, %arg6: memref<64x64xf32, #tpu.memory_space<vmem>>, %arg7: memref<1x64xf32, #tpu.memory_space<vmem>>, %arg8: memref<1x64xf32, #tpu.memory_space<vmem>>, %arg9: memref<1x1xf32, #tpu.memory_space<vmem>>, %arg10: memref<8x1xf32, #tpu.memory_space<vmem>>) attributes {dimension_semantics = [#tpu.dimension_semantics<parallel>], iteration_bounds = array<i64: 1>, scalar_prefetch = 0 : i64, scratch_operands = 0 : i64, tpu.core_type = #tpu.core_type<tc>, window_params = [{transform_indices = @transform_0, window_bounds = array<i64: 8, 16>}, {pipeline_mode = #tpu.pipeline_mode<synchronous>, transform_indices = @transform_1, window_bounds = array<i64: 16, 64>}, {pipeline_mode = #tpu.pipeline_mode<synchronous>, transform_indices = @transform_2, window_bounds = array<i64: 1, 64>}, {pipeline_mode = #tpu.pipeline_mode<synchronous>, transform_indices = @transform_3, window_bounds = array<i64: 64, 64>}, {pipeline_mode = #tpu.pipeline_mode<synchronous>, transform_indices = @transform_4, window_bounds = array<i64: 1, 64>}, {pipeline_mode = #tpu.pipeline_mode<synchronous>, transform_indices = @transform_5, window_bounds = array<i64: 64, 64>}, {pipeline_mode = #tpu.pipeline_mode<synchronous>, transform_indices = @transform_6, window_bounds = array<i64: 1, 64>}, {pipeline_mode = #tpu.pipeline_mode<synchronous>, transform_indices = @transform_7, window_bounds = array<i64: 1, 64>}, {pipeline_mode = #tpu.pipeline_mode<synchronous>, transform_indices = @transform_8, window_bounds = array<i64: 1, 1>}, {transform_indices = @transform_9, window_bounds = array<i64: 8, 1>}]} {
    %c0 = arith.constant 0 : index
    %c0_0 = arith.constant 0 : index
    %0 = vector.load %arg1[%c0, %c0_0] : memref<8x16xf32, #tpu.memory_space<vmem>>, vector<8x16xf32>
    %c0_1 = arith.constant 0 : index
    %c0_2 = arith.constant 0 : index
    %1 = vector.load %arg2[%c0_1, %c0_2] : memref<16x64xf32, #tpu.memory_space<vmem>>, vector<16x64xf32>
    %cst = arith.constant dense<0.000000e+00> : vector<8x64xf32>
    %2 = tpu.matmul %0, %1, %cst {dimension_numbers = #tpu.dot_dimension_numbers<[1], [0], [0], [1], [0, 0, 1, 1], [], []>} : vector<8x16xf32>, vector<16x64xf32>, vector<8x64xf32> -> vector<8x64xf32>
    %c0_3 = arith.constant 0 : index
    %c0_4 = arith.constant 0 : index
    %3 = vector.load %arg3[%c0_3, %c0_4] : memref<1x64xf32, #tpu.memory_space<vmem>>, vector<1x64xf32>
    %4 = vector.broadcast %3 : vector<1x64xf32> to vector<8x64xf32>
    %5 = arith.addf %2, %4 : vector<8x64xf32>
    %6 = math.tanh %5 : vector<8x64xf32>
    %c0_5 = arith.constant 0 : index
    %c0_6 = arith.constant 0 : index
    %7 = vector.load %arg4[%c0_5, %c0_6] : memref<64x64xf32, #tpu.memory_space<vmem>>, vector<64x64xf32>
    %cst_7 = arith.constant dense<0.000000e+00> : vector<8x64xf32>
    %8 = tpu.matmul %6, %7, %cst_7 {dimension_numbers = #tpu.dot_dimension_numbers<[1], [0], [0], [1], [0, 0, 1, 1], [], []>} : vector<8x64xf32>, vector<64x64xf32>, vector<8x64xf32> -> vector<8x64xf32>
    %c0_8 = arith.constant 0 : index
    %c0_9 = arith.constant 0 : index
    %9 = vector.load %arg5[%c0_8, %c0_9] : memref<1x64xf32, #tpu.memory_space<vmem>>, vector<1x64xf32>
    %10 = vector.broadcast %9 : vector<1x64xf32> to vector<8x64xf32>
    %11 = arith.addf %8, %10 : vector<8x64xf32>
    %12 = math.tanh %11 : vector<8x64xf32>
    %c0_10 = arith.constant 0 : index
    %c0_11 = arith.constant 0 : index
    %13 = vector.load %arg6[%c0_10, %c0_11] : memref<64x64xf32, #tpu.memory_space<vmem>>, vector<64x64xf32>
    %cst_12 = arith.constant dense<0.000000e+00> : vector<8x64xf32>
    %14 = tpu.matmul %12, %13, %cst_12 {dimension_numbers = #tpu.dot_dimension_numbers<[1], [0], [0], [1], [0, 0, 1, 1], [], []>} : vector<8x64xf32>, vector<64x64xf32>, vector<8x64xf32> -> vector<8x64xf32>
    %c0_13 = arith.constant 0 : index
    %c0_14 = arith.constant 0 : index
    %15 = vector.load %arg7[%c0_13, %c0_14] : memref<1x64xf32, #tpu.memory_space<vmem>>, vector<1x64xf32>
    %16 = vector.broadcast %15 : vector<1x64xf32> to vector<8x64xf32>
    %17 = arith.addf %14, %16 : vector<8x64xf32>
    %18 = math.tanh %17 : vector<8x64xf32>
    %c0_15 = arith.constant 0 : index
    %c0_16 = arith.constant 0 : index
    %19 = vector.load %arg8[%c0_15, %c0_16] : memref<1x64xf32, #tpu.memory_space<vmem>>, vector<1x64xf32>
    %20 = vector.broadcast %19 : vector<1x64xf32> to vector<8x64xf32>
    %21 = arith.mulf %18, %20 : vector<8x64xf32>
    %cst_17 = arith.constant dense<0.000000e+00> : vector<8xf32>
    %22 = vector.multi_reduction <add>, %21, %cst_17 [1] : vector<8x64xf32> to vector<8xf32>
    %23 = vector.shape_cast %22 : vector<8xf32> to vector<8x1xf32>
    %c0_18 = arith.constant 0 : index
    %c0_19 = arith.constant 0 : index
    %24 = vector.load %arg9[%c0_18, %c0_19] : memref<1x1xf32, #tpu.memory_space<vmem>>, vector<1x1xf32>
    %25 = vector.broadcast %24 : vector<1x1xf32> to vector<8x1xf32>
    %26 = arith.addf %23, %25 : vector<8x1xf32>
    %c0_20 = arith.constant 0 : index
    %c0_21 = arith.constant 0 : index
    %27 = vector.load %arg10[%c0_20, %c0_21] : memref<8x1xf32, #tpu.memory_space<vmem>>, vector<8x1xf32>
    tpu.vector_store %arg10[%c0_20, %c0_21], %26 {strides = array<i32>} : memref<8x1xf32, #tpu.memory_space<vmem>>, vector<8x1xf32>,
    return
  }
  func.func @transform_0(%arg0: i32) -> (i32, i32) {
    %c0_i32 = arith.constant 0 : i32
    %c0_i32_0 = arith.constant 0 : i32
    return %arg0, %c0_i32 : i32, i32
  }
  func.func @transform_1(%arg0: i32) -> (i32, i32) {
    %c0_i32 = arith.constant 0 : i32
    %c0_i32_0 = arith.constant 0 : i32
    %c0_i32_1 = arith.constant 0 : i32
    return %c0_i32, %c0_i32_0 : i32, i32
  }
  func.func @transform_2(%arg0: i32) -> (i32, i32) {
    %c0_i32 = arith.constant 0 : i32
    %c0_i32_0 = arith.constant 0 : i32
    %c0_i32_1 = arith.constant 0 : i32
    return %c0_i32, %c0_i32_0 : i32, i32
  }
  func.func @transform_3(%arg0: i32) -> (i32, i32) {
    %c0_i32 = arith.constant 0 : i32
    %c0_i32_0 = arith.constant 0 : i32
    %c0_i32_1 = arith.constant 0 : i32
    return %c0_i32, %c0_i32_0 : i32, i32
  }
  func.func @transform_4(%arg0: i32) -> (i32, i32) {
    %c0_i32 = arith.constant 0 : i32
    %c0_i32_0 = arith.constant 0 : i32
    %c0_i32_1 = arith.constant 0 : i32
    return %c0_i32, %c0_i32_0 : i32, i32
  }
  func.func @transform_5(%arg0: i32) -> (i32, i32) {
    %c0_i32 = arith.constant 0 : i32
    %c0_i32_0 = arith.constant 0 : i32
    %c0_i32_1 = arith.constant 0 : i32
    return %c0_i32, %c0_i32_0 : i32, i32
  }
  func.func @transform_6(%arg0: i32) -> (i32, i32) {
    %c0_i32 = arith.constant 0 : i32
    %c0_i32_0 = arith.constant 0 : i32
    %c0_i32_1 = arith.constant 0 : i32
    return %c0_i32, %c0_i32_0 : i32, i32
  }
  func.func @transform_7(%arg0: i32) -> (i32, i32) {
    %c0_i32 = arith.constant 0 : i32
    %c0_i32_0 = arith.constant 0 : i32
    %c0_i32_1 = arith.constant 0 : i32
    return %c0_i32, %c0_i32_0 : i32, i32
  }
  func.func @transform_8(%arg0: i32) -> (i32, i32) {
    %c0_i32 = arith.constant 0 : i32
    %c0_i32_0 = arith.constant 0 : i32
    %c0_i32_1 = arith.constant 0 : i32
    return %c0_i32, %c0_i32_0 : i32, i32
  }
  func.func @transform_9(%arg0: i32) -> (i32, i32) {
    %c0_i32 = arith.constant 0 : i32
    %c0_i32_0 = arith.constant 0 : i32
    return %arg0, %c0_i32 : i32, i32
  }
}

</mosaic_0001>

<bundles_post_ra>
// kernel: mlp_q_forward.1
= control target key start
LH: loop header
LB: loop body
LE: loop exit
PB: predicated region body
PF: predicated region fallthrough
CT: control target
= control target key end

     0   :  { %s729_s0 = inlined_call_operand.hbm [shape: f32[8,16], index: 0, kind: input, shape index: {}]   ;;  %s730_s1 = inlined_call_operand.hbm [shape: f32[16,64], index: 1, kind: input, shape index: {}]   ;;  %s731_s2 = inlined_call_operand.vmem [shape: f32[1,64], index: 2, kind: input, shape index: {}]   ;;  %s732_s3 = inlined_call_operand.hbm [shape: f32[64,64], index: 3, kind: input, shape index: {}]   ;;  %s733_s4 = inlined_call_operand.vmem [shape: f32[1,64], index: 4, kind: input, shape index: {}]   ;;  %s734_s5 = inlined_call_operand.hbm [shape: f32[64,64], index: 5, kind: input, shape index: {}]   ;;  %s735_s6 = inlined_call_operand.vmem [shape: f32[1,64], index: 6, kind: input, shape index: {}]   ;;  %s736_s7 = inlined_call_operand.vmem [shape: f32[1,64], index: 7, kind: input, shape index: {}]   ;;  %s737_s8 = inlined_call_operand.<no memory space> [shape: f32[1,1], index: 8, kind: input, shape index: {}]   ;;  %s738_s9 = inlined_call_operand.vmem [shape: f32[8,1], index: 9, kind: output, shape index: {}]  }
   0x1   :  { %v14_v0 = vstv %s737_s8 }
   0x2   :  { %15 = vst [vmem:[#allocation2] sm:$0x1] %v14_v0 }
   0x3   :  { %16 = vsyncpa [#allocation4], 0 }
   0x4   :  { %17 = vsyncpa [#allocation6], 0 }
   0x5   :  { %18 = vsyncpa [#allocation9], 0  ;;  %s589_s11 = smov [#allocation5]   ;;  %s495_s15 = scalar_lea.hbm %s730_s1, 256 }
   0x6   :  { %s34_s12 = sshll.u32 %s589_s11, 4  ;;  %p496_p0 = scmp.ne.s32.totalorder %s730_s1, %s495_s15  ;;  %s35_s12 = int_to_ptr.vmem [resolvable:$true] %s34_s12 }
   0x7   :  { %p499_p1 = scmp.lt.u32.totalorder %s495_s15, %s730_s1 }
   0x9   :  { %p501_p2 = pnand %p499_p1, %p496_p0 }
   0xb   :  { %504 = shalt.err (!%p501_p2)
}
   0xc   :  { %s505_s8 = scalar_lea.vmem %s35_s12, 256  ;;  %p510_p4 = scmp.lt.s32.totalorder %s35_s12, %s35_s12 }
   0xd   :  { %p506_p3 = scmp.ne.s32.totalorder %s35_s12, %s505_s8  ;;  %p511_p5 = scmp.lt.s32.totalorder %s505_s8, %s505_s8 }
   0xf   :  { %p512_p6 = por %p511_p5, %p510_p4 }
  0x11   :  { %p513_p7 = pnand %p512_p6, %p506_p3 }
  0x13   :  { %516 = shalt.err (!%p513_p7)
}
  0x14   :  { %s590_s20 = smov 128   ;;  %s591_s21 = smov 8  }
  0x15   :  { %40 = dma.hbm_to_vmem [thread:$0]  %s730_s1, 256, %s35_s12, [#allocation6], %s590_s20, %s590_s20, %s591_s21  }
  0x16   :  { %s592_s24 = smov [#allocation3]   ;;  %s593_s26 = smov [#allocation7]  }
  0x17   :  { %s25_s25 = sshll.u32 %s592_s24, 4  ;;  %s48_s27 = sshll.u32 %s593_s26, 4  ;;  %s26_s25 = int_to_ptr.vmem [resolvable:$true] %s25_s25  ;;  %s49_s27 = int_to_ptr.vmem [resolvable:$true] %s48_s27 }
  0x18   :  { %s517_s30 = scalar_lea.hbm %s729_s0, 128 }
  0x19   :  { %p518_p8 = scmp.ne.s32.totalorder %s729_s0, %s517_s30  ;;  %p521_p9 = scmp.lt.u32.totalorder %s517_s30, %s729_s0 }
  0x1b   :  { %p523_p10 = pnand %p521_p9, %p518_p8 }
  0x1d   :  { %526 = shalt.err (!%p523_p10)
}
  0x1e   :  { %s527_s1 = scalar_lea.vmem %s26_s25, 128  ;;  %p532_p12 = scmp.lt.s32.totalorder %s26_s25, %s26_s25 }
  0x1f   :  { %p528_p11 = scmp.ne.s32.totalorder %s26_s25, %s527_s1  ;;  %p533_p13 = scmp.lt.s32.totalorder %s527_s1, %s527_s1 }
  0x21   :  { %p534_p0 = por %p533_p13, %p532_p12 }
  0x23   :  { %p535_p1 = pnand %p534_p0, %p528_p11 }
  0x25   :  { %538 = shalt.err (!%p535_p1)
}
  0x26   :  { %28 = dma.hbm_to_vmem [thread:$0]  %s729_s0, 128, %s26_s25, [#allocation4]  }
  0x27   :  { %s539_s18 = scalar_lea.hbm %s732_s3, 1024 }
  0x28   :  { %p540_p2 = scmp.ne.s32.totalorder %s732_s3, %s539_s18  ;;  %p543_p3 = scmp.lt.u32.totalorder %s539_s18, %s732_s3 }
  0x2a   :  { %p545_p4 = pnand %p543_p3, %p540_p2 }
  0x2c   :  { %548 = shalt.err (!%p545_p4)
}
  0x2d   :  { %s549_s24 = scalar_lea.vmem %s49_s27, 1024  ;;  %p554_p6 = scmp.lt.s32.totalorder %s49_s27, %s49_s27 }
  0x2e   :  { %p550_p5 = scmp.ne.s32.totalorder %s49_s27, %s549_s24  ;;  %p555_p7 = scmp.lt.s32.totalorder %s549_s24, %s549_s24 }
  0x30   :  { %p556_p8 = por %p555_p7, %p554_p6 }
  0x32   :  { %p557_p9 = pnand %p556_p8, %p550_p5 }
  0x34   :  { %560 = shalt.err (!%p557_p9)
}
  0x35   :  { %54 = dma.hbm_to_vmem [thread:$0]  %s732_s3, 1024, %s49_s27, [#allocation6], %s590_s20, %s590_s20, %s591_s21  }
  0x36   :  { %s594_s26 = smov [#allocation8]   ;;  %s561_s10 = scalar_lea.hbm %s734_s5, 1024 }
  0x37   :  { %s62_s28 = sshll.u32 %s594_s26, 4  ;;  %p562_p10 = scmp.ne.s32.totalorder %s734_s5, %s561_s10  ;;  %s63_s28 = int_to_ptr.vmem [resolvable:$true] %s62_s28 }
  0x38   :  { %p565_p11 = scmp.lt.u32.totalorder %s561_s10, %s734_s5 }
  0x3a   :  { %p567_p12 = pnand %p565_p11, %p562_p10 }
  0x3c   :  { %570 = shalt.err (!%p567_p12)
}
  0x3d   :  { %s571_s12 = scalar_lea.vmem %s63_s28, 1024  ;;  %p576_p0 = scmp.lt.s32.totalorder %s63_s28, %s63_s28 }
  0x3e   :  { %p572_p13 = scmp.ne.s32.totalorder %s63_s28, %s571_s12  ;;  %p577_p1 = scmp.lt.s32.totalorder %s571_s12, %s571_s12 }
  0x40   :  { %p578_p2 = por %p577_p1, %p576_p0 }
  0x42   :  { %p579_p3 = pnand %p578_p2, %p572_p13 }
  0x44   :  { %582 = shalt.err (!%p579_p3)
}
  0x45   :  { %68 = dma.hbm_to_vmem [thread:$0]  %s734_s5, 1024, %s63_s28, [#allocation9], %s590_s20, %s590_s20, %s591_s21  }
  0x46   :  { %583 = dma.done.wait [#allocation4], 128  }
  0x47   :  { %584 = vsyncadd [#allocation4], 4294967168 }
  0x48   :  { %585 = dma.done.wait [#allocation6], 1280  }
  0x49   :  { %586 = vsyncadd [#allocation6], 4294966016 }
  0x4a   :  { %587 = dma.done.wait [#allocation9], 1024  }
  0x4b   :  { %588 = vsyncadd [#allocation9], 4294966272  ;;  %v595_v1 = vmov 0.0|0.0   ;;  %vm596_vm0 = vmmov 0   ;;  %v597_v2 = vmov 0.0   ;;  %v88_v3 = vld [vmem:[#allocation5] sm:$0xff] }
  0x4c   :  { %453 = vmatprep.subr.bf16.mxu0 %v595_v1  ;;  %412 = vmatprep.mubr.msk.f32.mxu0 %vm596_vm0, %v597_v2  ;;  %v89_v4 = vld [vmem:[#allocation5 + $0x8] sm:$0xff]  ;;  %v172_v6 = vld [vmem:[#allocation7] sm:$0xff]  ;;  %v173_v7 = vld [vmem:[#allocation7 + $0x8] sm:$0xff]  ;;  %vm97_vm1 = vcmask 130048   ;;  %vm187_vm2 = vcmask 523264   ;;  %vm370_vm3 = vcmask 7168  }
  0x4d   :  { %456 = vmatprep.subr.bf16.mxu1 %v595_v1  ;;  %431 = vmatprep.mubr.msk.f32.mxu1 %vm596_vm0, %v597_v2  ;;  %v454_v5 = vpack.c.bf16 %v89_v4, %v88_v3  ;;  %v457_v8 = vpack.c.bf16 %v173_v7, %v172_v6  ;;  %v87_v9 = vld [vmem:[#allocation3] sm:$0xff]  ;;  %v174_v10 = vld [vmem:[#allocation7 + $0x10] sm:$0xff]  ;;  %v175_v11 = vld [vmem:[#allocation7 + $0x18] sm:$0xff] }
  0x4e   :  { %v460_v12 = vpack.c.bf16 %v175_v11, %v174_v10  ;;  %v176_v13 = vld [vmem:[#allocation7 + $0x20] sm:$0xff]  ;;  %v177_v14 = vld [vmem:[#allocation7 + $0x28] sm:$0xff]  ;;  %v178_v16 = vld [vmem:[#allocation7 + $0x30] sm:$0xff] }
  0x4f   :  { %455 = vmatpush3.bf16.msra.mxu0 %v454_v5  ;;  %458 = vmatpush3.bf16.msra.mxu1 %v457_v8  ;;  %v463_v15 = vpack.c.bf16 %v177_v14, %v176_v13  ;;  %v179_v17 = vld [vmem:[#allocation7 + $0x38] sm:$0xff]  ;;  %v262_v19 = vld [vmem:[#allocation8] sm:$0xff]  ;;  %v263_v20 = vld [vmem:[#allocation8 + $0x8] sm:$0xff] }
  0x50   :  { %468 = vmatprep.subr.bf16.mxu0 %v595_v1  ;;  %459 = vmatprep.subr.bf16.mxu1 %v595_v1  ;;  %v466_v18 = vpack.c.bf16 %v179_v17, %v178_v16  ;;  %v469_v21 = vpack.c.bf16 %v263_v20, %v262_v19  ;;  %v379_v22 = vld [vmem:[%s731_s2] ss:$0 sm:$0xff]  ;;  %v264_v27 = vld [vmem:[#allocation8 + $0x10] sm:$0xff]  ;;  %v265_v28 = vld [vmem:[#allocation8 + $0x18] sm:$0xff] }
  0x51   :  { %v472_v29 = vpack.c.bf16 %v265_v28, %v264_v27  ;;  %v266_v30 = vld [vmem:[#allocation8 + $0x20] sm:$0xff]  ;;  %v267_v31 = vld [vmem:[#allocation8 + $0x28] sm:$0xff]  ;;  %v268_v33 = vld [vmem:[#allocation8 + $0x30] sm:$0xff] }
  0x52   :  { %413 = vmatmul.mubr.msk.f32.vlgmr.msra.gmra.mrb[0].mxu0 %vm97_vm1, %v87_v9  ;;  %v475_v32 = vpack.c.bf16 %v267_v31, %v266_v30  ;;  %v269_v34 = vld [vmem:[#allocation8 + $0x38] sm:$0xff]  ;;  %v381_v36 = vld [vmem:[%s733_s4] ss:$0 sm:$0xff] }
  0x53   :  { %450 = vmatprep.mubr.msk.f32.mxu0 %vm596_vm0, %v597_v2  ;;  %461 = vmatpush3.bf16.msra.mxu1 %v460_v12  ;;  %v478_v35 = vpack.c.bf16 %v269_v34, %v268_v33  ;;  %v383_v41 = vld [vmem:[%s735_s6] ss:$0 sm:$0xff] }
  0x54   :  { %462 = vmatprep.subr.bf16.mxu1 %v595_v1  ;;  %470 = vmatpush3.bf16.msra.mxu0 %v469_v21  ;;  %v385_v45 = vld [vmem:[%s736_s7] ss:$0 sm:$0xff] }
  0x55   :  { %471 = vmatprep.subr.bf16.mxu0 %v595_v1  ;;  %v386_v49 = vld [vmem:[#allocation2] ss:$0 sm:$0xff] }
  0x57   :  { %464 = vmatpush3.bf16.msra.mxu1 %v463_v15 }
  0x58   :  { %465 = vmatprep.subr.bf16.mxu1 %v595_v1  ;;  %473 = vmatpush3.bf16.msra.mxu0 %v472_v29 }
  0x59   :  { %474 = vmatprep.subr.bf16.mxu0 %v595_v1 }
  0x5b   :  { %467 = vmatpush3.bf16.msra.mxu1 %v466_v18 }
  0x5c   :  { %476 = vmatpush3.bf16.msra.mxu0 %v475_v32 }
  0x5d   :  { %477 = vmatprep.subr.bf16.mxu0 %v595_v1 }
  0x60   :  { %479 = vmatpush3.bf16.msra.mxu0 %v478_v35 }
 0x125   :  { %v167_v23 = vpop.f32.mrb[0].mxu0 }
 0x126   :  { %v168_v24 = vadd.f32 %v379_v22, %v167_v23  ;;  %v414_v25 = vpop.f32.mrb[1].mxu0 }
 0x128   :  { %489 = vtanh.f32 %v168_v24 }
 0x132   :  { %v490_v26 = vpop.eup %489 }
 0x133   :  { %432 = vmatmul.mubr.msk.f32.vlgmr.msra.gmra.mrb[0].mxu1 %vm187_vm2, %v490_v26 }
 0x206   :  { %v257_v37 = vpop.f32.mrb[0].mxu1 }
 0x207   :  { %v258_v38 = vadd.f32 %v381_v36, %v257_v37  ;;  %v433_v39 = vpop.f32.mrb[1].mxu1 }
 0x209   :  { %491 = vtanh.f32 %v258_v38 }
 0x213   :  { %v492_v40 = vpop.eup %491 }
 0x214   :  { %451 = vmatmul.mubr.msk.f32.vlgmr.msra.gmra.mrb[2].mxu0 %vm187_vm2, %v492_v40 }
 0x2e7   :  { %v346_v42 = vpop.f32.mrb[2].mxu0 }
 0x2e8   :  { %v347_v43 = vadd.f32 %v383_v41, %v346_v42  ;;  %v452_v44 = vpop.f32.mrb[3].mxu0 }
 0x2ea   :  { %493 = vtanh.f32 %v347_v43 }
 0x2f4   :  { %v494_v46 = vpop.eup %493 }
 0x2f5   :  { %v358_v47 = vmul.f32 %v494_v46, %v385_v45 }
 0x2f7   :  { %v359_v48 = vsel %vm187_vm2, %v358_v47, 0.0 }
 0x2f8   :  { %360 = vadd.xlane.f32.xlu0 %v359_v48 }
 0x385   :  { %v361_v50 = vpop.xlane.xlu0 %360 }
 0x386   :  { %v369_v51 = vadd.f32 %v386_v49, %v361_v50 }
 0x388   :  { %371 = vst.msk [vmem:[%s738_s9] sm:$0xff] %vm370_vm3, %v369_v51 }
 0x389   :  { %376 = vsyncpa [#allocation4], 1 }
 0x38a   :  { %377 = vsyncpa [#allocation6], 1 }
 0x38b   :  { %378 = vsyncpa [#allocation9], 1 }

</bundles_post_ra>
